<compile_context>
chip_gen: v7x
topology: tpu7x:2x2x1
jax: 0.10.0
libtpu: 0.0.40
codegen_flags: <defaults>
</compile_context>

<pallas_src>
import jax
import jax.numpy as jnp
from jax.experimental import pallas as pl
from jax.experimental.pallas import tpu as pltpu

LANE = 128


def _round_up(x, m):
    return ((x + m - 1) // m) * m


def _w_layout(H, L):
    """Column layout of the packed weight slab.

    Every logical segment starts on a 128-lane boundary so every static ref
    slice inside the kernel stays inside a single (8,128) lane tile.
    """
    segs = [
        ("wa_e", L), ("wa_h", L),            # attn Linear(2H -> L), row halves
        ("wc_e", H), ("wc_h", H),            # attn_combine Linear(2H -> H)
        ("wih_i", H), ("wih_f", H), ("wih_g", H), ("wih_o", H),
        ("whh_i", H), ("whh_f", H), ("whh_g", H), ("whh_o", H),
    ]
    offs, cur = {}, 0
    for name, width in segs:
        offs[name] = (cur, width)
        cur += _round_up(width, LANE)
    return offs, cur


def _pack_weights(params, H, L):
    offs, total = _w_layout(H, L)
    pieces = {
        "wa_e": params["w_attn"][:H], "wa_h": params["w_attn"][H:],
        "wc_e": params["w_comb"][:H], "wc_h": params["w_comb"][H:],
    }
    for g, gn in enumerate("ifgo"):
        pieces["wih_" + gn] = params["w_ih"][:, g * H:(g + 1) * H]
        pieces["whh_" + gn] = params["w_hh"][:, g * H:(g + 1) * H]
    w = jnp.zeros((H, total), jnp.float32)
    for name, (o, width) in offs.items():
        w = w.at[:, o:o + width].set(pieces[name].astype(jnp.float32))
    return w


def _pack_aux(params, H, L):
    """Biases + output-head row packed into one small (8, >=128) slab.

    row 0: b_attn (L)      row 1: b_comb (H)
    row 2..5: per-gate LSTM bias (b_ih + b_hh), gate order i,f,g,o (H each)
    row 6: w_out row (H)   row 7: b_out scalar
    """
    width = _round_up(max(H, L, 1), LANE)
    aux = jnp.zeros((8, width), jnp.float32)
    b_gate = (params["b_ih"] + params["b_hh"])[0]
    aux = aux.at[0, :L].set(params["b_attn"][0].astype(jnp.float32))
    aux = aux.at[1, :H].set(params["b_comb"][0].astype(jnp.float32))
    for g in range(4):
        aux = aux.at[2 + g, :H].set(
            b_gate[g * H:(g + 1) * H].astype(jnp.float32))
    aux = aux.at[6, :H].set(params["w_out"][:, 0].astype(jnp.float32))
    aux = aux.at[7, 0].set(params["b_out"][0, 0].astype(jnp.float32))
    return aux


def _decoder_kernel(emb_ref, h0_ref, c0_ref, enc_ref, w_ref, aux_ref,
                    out_ref, h_scr, c_scr):
    t = pl.program_id(0)
    B, H = h0_ref.shape
    L = enc_ref.shape[0]
    offs, _ = _w_layout(H, L)

    def w(name):                       # static ref column slice (no concat)
        o, width = offs[name]
        return w_ref[:, o:o + width]

    @pl.when(t == 0)
    def _():
        h_scr[...] = h0_ref[...]
        c_scr[...] = c0_ref[...]

    emb = emb_ref[0]                   # (B, H)
    h = h_scr[...]                     # (B, H)
    c = c_scr[...]                     # (B, H)

    # --- attention weights: softmax(Linear(cat(emb, h))) over max_length ---
    logits = (jnp.dot(emb, w("wa_e"), preferred_element_type=jnp.float32)
              + jnp.dot(h, w("wa_h"), preferred_element_type=jnp.float32)
              + aux_ref[0:1, 0:L])                                 # (B, L)
    m = jnp.max(logits, axis=1, keepdims=True)
    e = jnp.exp(logits - m)
    attn = e / jnp.sum(e, axis=1, keepdims=True)                   # (B, L)

    # --- attn_applied = attn @ encoder_outputs (bmm w/ broadcast batch) ---
    applied = jnp.dot(attn, enc_ref[...],
                      preferred_element_type=jnp.float32)          # (B, H)

    # --- attn_combine + relu (concat-free split matmul) ---
    comb = (jnp.dot(emb, w("wc_e"), preferred_element_type=jnp.float32)
            + jnp.dot(applied, w("wc_h"), preferred_element_type=jnp.float32)
            + aux_ref[1:2, 0:H])                                   # (B, H)
    x = jnp.maximum(comb, 0.0)

    # --- one LSTM step, per-gate dots (PyTorch gate order i, f, g, o) ---
    def gate(idx, name):
        return (jnp.dot(x, w("wih_" + name),
                        preferred_element_type=jnp.float32)
                + jnp.dot(h, w("whh_" + name),
                          preferred_element_type=jnp.float32)
                + aux_ref[2 + idx:3 + idx, 0:H])

    i_g = jax.nn.sigmoid(gate(0, "i"))
    f_g = jax.nn.sigmoid(gate(1, "f"))
    g_g = jnp.tanh(gate(2, "g"))
    o_g = jax.nn.sigmoid(gate(3, "o"))
    c_new = f_g * c + i_g * g_g
    h_new = o_g * jnp.tanh(c_new)
    h_scr[...] = h_new
    c_scr[...] = c_new

    # --- output head Linear(H -> 1) as a VPU reduction (no MXU round trip) ---
    out_val = (jnp.sum(h_new * aux_ref[6:7, 0:H], axis=1, keepdims=True)
               + aux_ref[7:8, 0:1])                                # (B, 1)

    # --- single lane-dense packed store: [out | attn | h | c | 0-pad] ---
    pieces = [out_val, attn, h_new, c_new]
    pad = out_ref.shape[-1] - (1 + L + 2 * H)
    if pad:
        pieces.append(jnp.zeros((B, pad), jnp.float32))
    out_ref[0] = jnp.concatenate(pieces, axis=1)


def attn_decoder_multistep(params, input_ids, hidden, encoder_outputs):
    """Run T decoder steps in one pallas_call (teacher-forced token sequence).

    input_ids:        (T, B) int32 token indices
    hidden:           tuple (h, c), each (1, B, H) float32
    encoder_outputs:  (L, H) float32
    returns (outputs (T,B,1), (h_T (1,B,H), c_T (1,B,H)), attn (T,B,L))
    """
    h0, c0 = hidden
    T, B = input_ids.shape
    H = h0.shape[-1]
    L = encoder_outputs.shape[0]

    # embedding lookup; nn.Dropout == identity in eval mode
    emb = jnp.take(params["embedding"], input_ids.reshape(-1), axis=0)
    emb = emb.reshape(T, B, H).astype(jnp.float32)

    w_slab = _pack_weights(params, H, L)
    aux = _pack_aux(params, H, L)
    slab_w = _round_up(1 + L + 2 * H, LANE)

    out_slab = pl.pallas_call(
        _decoder_kernel,
        out_shape=jax.ShapeDtypeStruct((T, B, slab_w), jnp.float32),
        grid=(T,),
        in_specs=[
            pl.BlockSpec((1, B, H), lambda t: (t, 0, 0)),   # per-step embedding
            pl.BlockSpec((B, H), lambda t: (0, 0)),         # h0  (DMA'd once)
            pl.BlockSpec((B, H), lambda t: (0, 0)),         # c0  (DMA'd once)
            pl.BlockSpec((L, H), lambda t: (0, 0)),         # encoder outputs
            pl.BlockSpec(w_slab.shape, lambda t: (0, 0)),   # packed weights
            pl.BlockSpec(aux.shape, lambda t: (0, 0)),      # biases + out row
        ],
        out_specs=pl.BlockSpec((1, B, slab_w), lambda t: (t, 0, 0)),
        scratch_shapes=[pltpu.VMEM((B, H), jnp.float32),    # resident h state
                        pltpu.VMEM((B, H), jnp.float32)],   # resident c state
        compiler_params=pltpu.CompilerParams(
            # recurrence over time -> sequential grid axis
            dimension_semantics=("arbitrary",)),
    )(emb,
      h0[0].astype(jnp.float32), c0[0].astype(jnp.float32),
      encoder_outputs.astype(jnp.float32), w_slab, aux)

    outputs = out_slab[:, :, 0:1]                            # (T, B, 1)
    attn_w = out_slab[:, :, 1:1 + L]                         # (T, B, L)
    h_t = out_slab[-1, :, 1 + L:1 + L + H][None]             # (1, B, H)
    c_t = out_slab[-1, :, 1 + L + H:1 + L + 2 * H][None]     # (1, B, H)
    return outputs, (h_t, c_t), attn_w


def attn_decoder_forward(params, input_ids, hidden, encoder_outputs):
    """Single decoder step, matching AttnDecoderRNN.forward."""
    outs, (h1, c1), attn = attn_decoder_multistep(
        params, input_ids[None, :], hidden, encoder_outputs)
    return outs[0], (h1, c1), attn[0]


def init_params(key, vocab_size, hidden_size, max_length):
    ks = jax.random.split(key, 10)
    H, L, V = hidden_size, max_length, vocab_size
    s = 0.1
    return {
        "embedding": s * jax.random.normal(ks[0], (V, H), jnp.float32),
        # nn.Linear(2H -> L), stored transposed (in, out)
        "w_attn": s * jax.random.normal(ks[1], (2 * H, L), jnp.float32),
        "b_attn": s * jax.random.normal(ks[2], (1, L), jnp.float32),
        # nn.Linear(2H -> H)
        "w_comb": s * jax.random.normal(ks[3], (2 * H, H), jnp.float32),
        "b_comb": s * jax.random.normal(ks[4], (1, H), jnp.float32),
        # nn.LSTM(H -> H), weights transposed: (in, 4H), gate order i,f,g,o
        "w_ih": s * jax.random.normal(ks[5], (H, 4 * H), jnp.float32),
        "w_hh": s * jax.random.normal(ks[6], (H, 4 * H), jnp.float32),
        "b_ih": s * jax.random.normal(ks[7], (1, 4 * H), jnp.float32),
        "b_hh": s * jax.random.normal(ks[8], (1, 4 * H), jnp.float32),
        # nn.Linear(H -> 1)
        "w_out": s * jax.random.normal(ks[9], (H, 1), jnp.float32),
        "b_out": jnp.zeros((1, 1), jnp.float32),
    }


def _reference_step(params, emb, h, c, enc):
    """Pure-JAX reference of one AttnDecoderRNN.forward step."""
    H = h.shape[1]
    cat1 = jnp.concatenate([emb, h], axis=1)
    attn = jax.nn.softmax(cat1 @ params["w_attn"] + params["b_attn"], axis=1)
    applied = attn @ enc
    cat2 = jnp.concatenate([emb, applied], axis=1)
    x = jnp.maximum(cat2 @ params["w_comb"] + params["b_comb"], 0.0)
    gates = (x @ params["w_ih"] + params["b_ih"]
             + h @ params["w_hh"] + params["b_hh"])
    i = jax.nn.sigmoid(gates[:, 0 * H:1 * H])
    f = jax.nn.sigmoid(gates[:, 1 * H:2 * H])
    g = jnp.tanh(gates[:, 2 * H:3 * H])
    o = jax.nn.sigmoid(gates[:, 3 * H:4 * H])
    c_new = f * c + i * g
    h_new = o * jnp.tanh(c_new)
    out = h_new @ params["w_out"] + params["b_out"]
    return out, h_new, c_new, attn


if __name__ == "__main__":
    B, H, L, V, T = 8, 32, 8, 16, 6   # batch, hidden, max_length, vocab, steps

    key = jax.random.PRNGKey(0)
    kp, ki, ks, kh, kc, ke = jax.random.split(key, 6)
    params = init_params(kp, V, H, L)

    input_ids = jax.random.randint(ki, (B,), 0, V, dtype=jnp.int32)
    seq_ids = jax.random.randint(ks, (T, B), 0, V, dtype=jnp.int32)
    h0 = jax.random.normal(kh, (1, B, H), jnp.float32)
    c0 = jax.random.normal(kc, (1, B, H), jnp.float32)
    encoder_outputs = jax.random.normal(ke, (L, H), jnp.float32)

    # ---- single step (matches AttnDecoderRNN.forward) ----
    out, (h1, c1), attn = attn_decoder_forward(
        params, input_ids, (h0, c0), encoder_outputs)
    jax.block_until_ready((out, h1, c1, attn))
    assert out.shape == (B, 1)
    assert h1.shape == (1, B, H) and c1.shape == (1, B, H)
    assert attn.shape == (B, L)

    emb0 = jnp.take(params["embedding"], input_ids, axis=0)
    r_out, r_h, r_c, r_attn = _reference_step(params, emb0, h0[0], c0[0],
                                              encoder_outputs)
    for got, ref in ((out, r_out), (h1[0], r_h), (c1[0], r_c), (attn, r_attn)):
        assert float(jnp.max(jnp.abs(got - ref))) < 3e-2

    # ---- T-step decode: one pallas_call, weights DMA'd once ----
    outs, (hT, cT), attns = attn_decoder_multistep(
        params, seq_ids, (h0, c0), encoder_outputs)
    jax.block_until_ready((outs, hT, cT, attns))
    assert outs.shape == (T, B, 1)
    assert attns.shape == (T, B, L)
    assert hT.shape == (1, B, H) and cT.shape == (1, B, H)

    rh, rc = h0[0], c0[0]
    for step in range(T):
        emb_t = jnp.take(params["embedding"], seq_ids[step], axis=0)
        r_out, rh, rc, r_attn = _reference_step(params, emb_t, rh, rc,
                                                encoder_outputs)
        assert float(jnp.max(jnp.abs(outs[step] - r_out))) < 3e-2
        assert float(jnp.max(jnp.abs(attns[step] - r_attn))) < 3e-2
    assert float(jnp.max(jnp.abs(hT[0] - rh))) < 3e-2
    assert float(jnp.max(jnp.abs(cT[0] - rc))) < 3e-2

    print("KERNEL_OK")
</pallas_src>

<mosaic_0001>
module attributes {stable_mosaic.version = 11 : i64} {
  func.func @_decoder_kernel(%arg0: i32, %arg1: memref<1x8x32xf32, #tpu.memory_space<vmem>>, %arg2: memref<8x32xf32, #tpu.memory_space<vmem>>, %arg3: memref<8x32xf32, #tpu.memory_space<vmem>>, %arg4: memref<8x32xf32, #tpu.memory_space<vmem>>, %arg5: memref<32x1536xf32, #tpu.memory_space<vmem>>, %arg6: memref<8x128xf32, #tpu.memory_space<vmem>>, %arg7: memref<1x8x128xf32, #tpu.memory_space<vmem>>, %arg8: memref<8x32xf32, #tpu.memory_space<vmem>>, %arg9: memref<8x32xf32, #tpu.memory_space<vmem>>) attributes {dimension_semantics = [#tpu.dimension_semantics<arbitrary>], iteration_bounds = array<i64: 1>, scalar_prefetch = 0 : i64, scratch_operands = 2 : i64, tpu.core_type = #tpu.core_type<tc>, window_params = [{transform_indices = @transform_0, window_bounds = array<i64: 1, 8, 32>}, {pipeline_mode = #tpu.pipeline_mode<synchronous>, transform_indices = @transform_1, window_bounds = array<i64: 8, 32>}, {pipeline_mode = #tpu.pipeline_mode<synchronous>, transform_indices = @transform_2, window_bounds = array<i64: 8, 32>}, {pipeline_mode = #tpu.pipeline_mode<synchronous>, transform_indices = @transform_3, window_bounds = array<i64: 8, 32>}, {pipeline_mode = #tpu.pipeline_mode<synchronous>, transform_indices = @transform_4, window_bounds = array<i64: 32, 1536>}, {pipeline_mode = #tpu.pipeline_mode<synchronous>, transform_indices = @transform_5, window_bounds = array<i64: 8, 128>}, {transform_indices = @transform_6, window_bounds = array<i64: 1, 8, 128>}]} {
    %c0_i32 = arith.constant 0 : i32
    %0 = arith.cmpi eq, %arg0, %c0_i32 : i32
    %1 = arith.extui %0 : i1 to i32
    %c0_i32_0 = arith.constant 0 : i32
    %2 = arith.cmpi ne, %1, %c0_i32_0 : i32
    scf.if %2 {
      %c0_58 = arith.constant 0 : index
      %c0_59 = arith.constant 0 : index
      %104 = vector.load %arg2[%c0_58, %c0_59] : memref<8x32xf32, #tpu.memory_space<vmem>>, vector<8x32xf32>
      %c0_60 = arith.constant 0 : index
      %c0_61 = arith.constant 0 : index
      %105 = vector.load %arg8[%c0_60, %c0_61] : memref<8x32xf32, #tpu.memory_space<vmem>>, vector<8x32xf32>
      tpu.vector_store %arg8[%c0_60, %c0_61], %104 {strides = array<i32>} : memref<8x32xf32, #tpu.memory_space<vmem>>, vector<8x32xf32>,
      %c0_62 = arith.constant 0 : index
      %c0_63 = arith.constant 0 : index
      %106 = vector.load %arg3[%c0_62, %c0_63] : memref<8x32xf32, #tpu.memory_space<vmem>>, vector<8x32xf32>
      %c0_64 = arith.constant 0 : index
      %c0_65 = arith.constant 0 : index
      %107 = vector.load %arg9[%c0_64, %c0_65] : memref<8x32xf32, #tpu.memory_space<vmem>>, vector<8x32xf32>
      tpu.vector_store %arg9[%c0_64, %c0_65], %106 {strides = array<i32>} : memref<8x32xf32, #tpu.memory_space<vmem>>, vector<8x32xf32>,
    } else {
    }
    %c0 = arith.constant 0 : index
    %c0_1 = arith.constant 0 : index
    %c0_2 = arith.constant 0 : index
    %3 = vector.load %arg1[%c0, %c0_1, %c0_2] : memref<1x8x32xf32, #tpu.memory_space<vmem>>, vector<1x8x32xf32>
    %4 = vector.shape_cast %3 : vector<1x8x32xf32> to vector<8x32xf32>
    %c0_3 = arith.constant 0 : index
    %c0_4 = arith.constant 0 : index
    %5 = vector.load %arg8[%c0_3, %c0_4] : memref<8x32xf32, #tpu.memory_space<vmem>>, vector<8x32xf32>
    %c0_5 = arith.constant 0 : index
    %c0_6 = arith.constant 0 : index
    %6 = vector.load %arg9[%c0_5, %c0_6] : memref<8x32xf32, #tpu.memory_space<vmem>>, vector<8x32xf32>
    %c0_7 = arith.constant 0 : index
    %c0_8 = arith.constant 0 : index
    %7 = vector.load %arg5[%c0_7, %c0_8] : memref<32x1536xf32, #tpu.memory_space<vmem>>, vector<32x8xf32>
    %cst = arith.constant dense<0.000000e+00> : vector<8x8xf32>
    %8 = tpu.matmul %4, %7, %cst {dimension_numbers = #tpu.dot_dimension_numbers<[1], [0], [0], [1], [0, 0, 1, 1], [], []>} : vector<8x32xf32>, vector<32x8xf32>, vector<8x8xf32> -> vector<8x8xf32>
    %c0_9 = arith.constant 0 : index
    %c128 = arith.constant 128 : index
    %9 = vector.load %arg5[%c0_9, %c128] : memref<32x1536xf32, #tpu.memory_space<vmem>>, vector<32x8xf32>
    %cst_10 = arith.constant dense<0.000000e+00> : vector<8x8xf32>
    %10 = tpu.matmul %5, %9, %cst_10 {dimension_numbers = #tpu.dot_dimension_numbers<[1], [0], [0], [1], [0, 0, 1, 1], [], []>} : vector<8x32xf32>, vector<32x8xf32>, vector<8x8xf32> -> vector<8x8xf32>
    %11 = arith.addf %8, %10 : vector<8x8xf32>
    %c0_11 = arith.constant 0 : index
    %c0_12 = arith.constant 0 : index
    %12 = vector.load %arg6[%c0_11, %c0_12] : memref<8x128xf32, #tpu.memory_space<vmem>>, vector<1x8xf32>
    %13 = vector.broadcast %12 : vector<1x8xf32> to vector<8x8xf32>
    %14 = arith.addf %11, %13 : vector<8x8xf32>
    %cst_13 = arith.constant dense<0xFF800000> : vector<8xf32>
    %15 = vector.multi_reduction <maximumf>, %14, %cst_13 [1] : vector<8x8xf32> to vector<8xf32>
    %16 = vector.shape_cast %15 : vector<8xf32> to vector<8x1xf32>
    %17 = vector.broadcast %16 : vector<8x1xf32> to vector<8x8xf32>
    %18 = arith.subf %14, %17 : vector<8x8xf32>
    %19 = math.exp %18 : vector<8x8xf32>
    %cst_14 = arith.constant dense<0.000000e+00> : vector<8xf32>
    %20 = vector.multi_reduction <add>, %19, %cst_14 [1] : vector<8x8xf32> to vector<8xf32>
    %21 = vector.shape_cast %20 : vector<8xf32> to vector<8x1xf32>
    %22 = vector.broadcast %21 : vector<8x1xf32> to vector<8x8xf32>
    %23 = arith.divf %19, %22 : vector<8x8xf32>
    %c0_15 = arith.constant 0 : index
    %c0_16 = arith.constant 0 : index
    %24 = vector.load %arg4[%c0_15, %c0_16] : memref<8x32xf32, #tpu.memory_space<vmem>>, vector<8x32xf32>
    %cst_17 = arith.constant dense<0.000000e+00> : vector<8x32xf32>
    %25 = tpu.matmul %23, %24, %cst_17 {dimension_numbers = #tpu.dot_dimension_numbers<[1], [0], [0], [1], [0, 0, 1, 1], [], []>} : vector<8x8xf32>, vector<8x32xf32>, vector<8x32xf32> -> vector<8x32xf32>
    %c0_18 = arith.constant 0 : index
    %c256 = arith.constant 256 : index
    %26 = vector.load %arg5[%c0_18, %c256] : memref<32x1536xf32, #tpu.memory_space<vmem>>, vector<32x32xf32>
    %cst_19 = arith.constant dense<0.000000e+00> : vector<8x32xf32>
    %27 = tpu.matmul %4, %26, %cst_19 {dimension_numbers = #tpu.dot_dimension_numbers<[1], [0], [0], [1], [0, 0, 1, 1], [], []>} : vector<8x32xf32>, vector<32x32xf32>, vector<8x32xf32> -> vector<8x32xf32>
    %c0_20 = arith.constant 0 : index
    %c384 = arith.constant 384 : index
    %28 = vector.load %arg5[%c0_20, %c384] : memref<32x1536xf32, #tpu.memory_space<vmem>>, vector<32x32xf32>
    %cst_21 = arith.constant dense<0.000000e+00> : vector<8x32xf32>
    %29 = tpu.matmul %25, %28, %cst_21 {dimension_numbers = #tpu.dot_dimension_numbers<[1], [0], [0], [1], [0, 0, 1, 1], [], []>} : vector<8x32xf32>, vector<32x32xf32>, vector<8x32xf32> -> vector<8x32xf32>
    %30 = arith.addf %27, %29 : vector<8x32xf32>
    %c1 = arith.constant 1 : index
    %c0_22 = arith.constant 0 : index
    %31 = vector.load %arg6[%c1, %c0_22] : memref<8x128xf32, #tpu.memory_space<vmem>>, vector<1x32xf32>
    %32 = vector.broadcast %31 : vector<1x32xf32> to vector<8x32xf32>
    %33 = arith.addf %30, %32 : vector<8x32xf32>
    %cst_23 = arith.constant 0.000000e+00 : f32
    %34 = vector.broadcast %cst_23 : f32 to vector<8x32xf32>
    %35 = arith.maximumf %33, %34 : vector<8x32xf32>
    %c0_24 = arith.constant 0 : index
    %c512 = arith.constant 512 : index
    %36 = vector.load %arg5[%c0_24, %c512] : memref<32x1536xf32, #tpu.memory_space<vmem>>, vector<32x32xf32>
    %cst_25 = arith.constant dense<0.000000e+00> : vector<8x32xf32>
    %37 = tpu.matmul %35, %36, %cst_25 {dimension_numbers = #tpu.dot_dimension_numbers<[1], [0], [0], [1], [0, 0, 1, 1], [], []>} : vector<8x32xf32>, vector<32x32xf32>, vector<8x32xf32> -> vector<8x32xf32>
    %c0_26 = arith.constant 0 : index
    %c1024 = arith.constant 1024 : index
    %38 = vector.load %arg5[%c0_26, %c1024] : memref<32x1536xf32, #tpu.memory_space<vmem>>, vector<32x32xf32>
    %cst_27 = arith.constant dense<0.000000e+00> : vector<8x32xf32>
    %39 = tpu.matmul %5, %38, %cst_27 {dimension_numbers = #tpu.dot_dimension_numbers<[1], [0], [0], [1], [0, 0, 1, 1], [], []>} : vector<8x32xf32>, vector<32x32xf32>, vector<8x32xf32> -> vector<8x32xf32>
    %40 = arith.addf %37, %39 : vector<8x32xf32>
    %c2 = arith.constant 2 : index
    %c0_28 = arith.constant 0 : index
    %41 = vector.load %arg6[%c2, %c0_28] : memref<8x128xf32, #tpu.memory_space<vmem>>, vector<1x32xf32>
    %42 = vector.broadcast %41 : vector<1x32xf32> to vector<8x32xf32>
    %43 = arith.addf %40, %42 : vector<8x32xf32>
    %44 = arith.negf %43 : vector<8x32xf32>
    %45 = math.exp %44 : vector<8x32xf32>
    %cst_29 = arith.constant 1.000000e+00 : f32
    %46 = vector.broadcast %cst_29 : f32 to vector<8x32xf32>
    %47 = arith.addf %46, %45 : vector<8x32xf32>
    %48 = arith.divf %46, %47 : vector<8x32xf32>
    %c0_30 = arith.constant 0 : index
    %c640 = arith.constant 640 : index
    %49 = vector.load %arg5[%c0_30, %c640] : memref<32x1536xf32, #tpu.memory_space<vmem>>, vector<32x32xf32>
    %cst_31 = arith.constant dense<0.000000e+00> : vector<8x32xf32>
    %50 = tpu.matmul %35, %49, %cst_31 {dimension_numbers = #tpu.dot_dimension_numbers<[1], [0], [0], [1], [0, 0, 1, 1], [], []>} : vector<8x32xf32>, vector<32x32xf32>, vector<8x32xf32> -> vector<8x32xf32>
    %c0_32 = arith.constant 0 : index
    %c1152 = arith.constant 1152 : index
    %51 = vector.load %arg5[%c0_32, %c1152] : memref<32x1536xf32, #tpu.memory_space<vmem>>, vector<32x32xf32>
    %cst_33 = arith.constant dense<0.000000e+00> : vector<8x32xf32>
    %52 = tpu.matmul %5, %51, %cst_33 {dimension_numbers = #tpu.dot_dimension_numbers<[1], [0], [0], [1], [0, 0, 1, 1], [], []>} : vector<8x32xf32>, vector<32x32xf32>, vector<8x32xf32> -> vector<8x32xf32>
    %53 = arith.addf %50, %52 : vector<8x32xf32>
    %c3 = arith.constant 3 : index
    %c0_34 = arith.constant 0 : index
    %54 = vector.load %arg6[%c3, %c0_34] : memref<8x128xf32, #tpu.memory_space<vmem>>, vector<1x32xf32>
    %55 = vector.broadcast %54 : vector<1x32xf32> to vector<8x32xf32>
    %56 = arith.addf %53, %55 : vector<8x32xf32>
    %57 = arith.negf %56 : vector<8x32xf32>
    %58 = math.exp %57 : vector<8x32xf32>
    %cst_35 = arith.constant 1.000000e+00 : f32
    %59 = vector.broadcast %cst_35 : f32 to vector<8x32xf32>
    %60 = arith.addf %59, %58 : vector<8x32xf32>
    %61 = arith.divf %59, %60 : vector<8x32xf32>
    %c0_36 = arith.constant 0 : index
    %c768 = arith.constant 768 : index
    %62 = vector.load %arg5[%c0_36, %c768] : memref<32x1536xf32, #tpu.memory_space<vmem>>, vector<32x32xf32>
    %cst_37 = arith.constant dense<0.000000e+00> : vector<8x32xf32>
    %63 = tpu.matmul %35, %62, %cst_37 {dimension_numbers = #tpu.dot_dimension_numbers<[1], [0], [0], [1], [0, 0, 1, 1], [], []>} : vector<8x32xf32>, vector<32x32xf32>, vector<8x32xf32> -> vector<8x32xf32>
    %c0_38 = arith.constant 0 : index
    %c1280 = arith.constant 1280 : index
    %64 = vector.load %arg5[%c0_38, %c1280] : memref<32x1536xf32, #tpu.memory_space<vmem>>, vector<32x32xf32>
    %cst_39 = arith.constant dense<0.000000e+00> : vector<8x32xf32>
    %65 = tpu.matmul %5, %64, %cst_39 {dimension_numbers = #tpu.dot_dimension_numbers<[1], [0], [0], [1], [0, 0, 1, 1], [], []>} : vector<8x32xf32>, vector<32x32xf32>, vector<8x32xf32> -> vector<8x32xf32>
    %66 = arith.addf %63, %65 : vector<8x32xf32>
    %c4 = arith.constant 4 : index
    %c0_40 = arith.constant 0 : index
    %67 = vector.load %arg6[%c4, %c0_40] : memref<8x128xf32, #tpu.memory_space<vmem>>, vector<1x32xf32>
    %68 = vector.broadcast %67 : vector<1x32xf32> to vector<8x32xf32>
    %69 = arith.addf %66, %68 : vector<8x32xf32>
    %70 = math.tanh %69 : vector<8x32xf32>
    %c0_41 = arith.constant 0 : index
    %c896 = arith.constant 896 : index
    %71 = vector.load %arg5[%c0_41, %c896] : memref<32x1536xf32, #tpu.memory_space<vmem>>, vector<32x32xf32>
    %cst_42 = arith.constant dense<0.000000e+00> : vector<8x32xf32>
    %72 = tpu.matmul %35, %71, %cst_42 {dimension_numbers = #tpu.dot_dimension_numbers<[1], [0], [0], [1], [0, 0, 1, 1], [], []>} : vector<8x32xf32>, vector<32x32xf32>, vector<8x32xf32> -> vector<8x32xf32>
    %c0_43 = arith.constant 0 : index
    %c1408 = arith.constant 1408 : index
    %73 = vector.load %arg5[%c0_43, %c1408] : memref<32x1536xf32, #tpu.memory_space<vmem>>, vector<32x32xf32>
    %cst_44 = arith.constant dense<0.000000e+00> : vector<8x32xf32>
    %74 = tpu.matmul %5, %73, %cst_44 {dimension_numbers = #tpu.dot_dimension_numbers<[1], [0], [0], [1], [0, 0, 1, 1], [], []>} : vector<8x32xf32>, vector<32x32xf32>, vector<8x32xf32> -> vector<8x32xf32>
    %75 = arith.addf %72, %74 : vector<8x32xf32>
    %c5 = arith.constant 5 : index
    %c0_45 = arith.constant 0 : index
    %76 = vector.load %arg6[%c5, %c0_45] : memref<8x128xf32, #tpu.memory_space<vmem>>, vector<1x32xf32>
    %77 = vector.broadcast %76 : vector<1x32xf32> to vector<8x32xf32>
    %78 = arith.addf %75, %77 : vector<8x32xf32>
    %79 = arith.negf %78 : vector<8x32xf32>
    %80 = math.exp %79 : vector<8x32xf32>
    %cst_46 = arith.constant 1.000000e+00 : f32
    %81 = vector.broadcast %cst_46 : f32 to vector<8x32xf32>
    %82 = arith.addf %81, %80 : vector<8x32xf32>
    %83 = arith.divf %81, %82 : vector<8x32xf32>
    %84 = arith.mulf %61, %6 : vector<8x32xf32>
    %85 = arith.mulf %48, %70 : vector<8x32xf32>
    %86 = arith.addf %84, %85 : vector<8x32xf32>
    %87 = math.tanh %86 : vector<8x32xf32>
    %88 = arith.mulf %83, %87 : vector<8x32xf32>
    %c0_47 = arith.constant 0 : index
    %c0_48 = arith.constant 0 : index
    %89 = vector.load %arg8[%c0_47, %c0_48] : memref<8x32xf32, #tpu.memory_space<vmem>>, vector<8x32xf32>
    tpu.vector_store %arg8[%c0_47, %c0_48], %88 {strides = array<i32>} : memref<8x32xf32, #tpu.memory_space<vmem>>, vector<8x32xf32>,
    %c0_49 = arith.constant 0 : index
    %c0_50 = arith.constant 0 : index
    %90 = vector.load %arg9[%c0_49, %c0_50] : memref<8x32xf32, #tpu.memory_space<vmem>>, vector<8x32xf32>
    tpu.vector_store %arg9[%c0_49, %c0_50], %86 {strides = array<i32>} : memref<8x32xf32, #tpu.memory_space<vmem>>, vector<8x32xf32>,
    %c6 = arith.constant 6 : index
    %c0_51 = arith.constant 0 : index
    %91 = vector.load %arg6[%c6, %c0_51] : memref<8x128xf32, #tpu.memory_space<vmem>>, vector<1x32xf32>
    %92 = vector.broadcast %91 : vector<1x32xf32> to vector<8x32xf32>
    %93 = arith.mulf %88, %92 : vector<8x32xf32>
    %cst_52 = arith.constant dense<0.000000e+00> : vector<8xf32>
    %94 = vector.multi_reduction <add>, %93, %cst_52 [1] : vector<8x32xf32> to vector<8xf32>
    %95 = vector.shape_cast %94 : vector<8xf32> to vector<8x1xf32>
    %c7 = arith.constant 7 : index
    %c0_53 = arith.constant 0 : index
    %96 = vector.load %arg6[%c7, %c0_53] : memref<8x128xf32, #tpu.memory_space<vmem>>, vector<1x1xf32>
    %97 = vector.broadcast %96 : vector<1x1xf32> to vector<8x1xf32>
    %98 = arith.addf %95, %97 : vector<8x1xf32>
    %cst_54 = arith.constant 0.000000e+00 : f32
    %99 = vector.broadcast %cst_54 : f32 to vector<8x55xf32>
    %100 = tpu.concatenate %98, %23, %88, %86, %99 in 1 : vector<8x1xf32>, vector<8x8xf32>, vector<8x32xf32>, vector<8x32xf32>, vector<8x55xf32> -> vector<8x128xf32>
    %c0_55 = arith.constant 0 : index
    %c0_56 = arith.constant 0 : index
    %c0_57 = arith.constant 0 : index
    %101 = vector.load %arg7[%c0_55, %c0_56, %c0_57] : memref<1x8x128xf32, #tpu.memory_space<vmem>>, vector<1x8x128xf32>
    %102 = vector.shape_cast %101 : vector<1x8x128xf32> to vector<8x128xf32>
    %103 = vector.shape_cast %100 : vector<8x128xf32> to vector<1x8x128xf32>
    tpu.vector_store %arg7[%c0_55, %c0_56, %c0_57], %103 {strides = array<i32>} : memref<1x8x128xf32, #tpu.memory_space<vmem>>, vector<1x8x128xf32>,
    return
  }
  func.func @transform_0(%arg0: i32) -> (i32, i32, i32) {
    %c0_i32 = arith.constant 0 : i32
    %c0_i32_0 = arith.constant 0 : i32
    %c0_i32_1 = arith.constant 0 : i32
    return %arg0, %c0_i32, %c0_i32_0 : i32, i32, i32
  }
  func.func @transform_1(%arg0: i32) -> (i32, i32) {
    %c0_i32 = arith.constant 0 : i32
    %c0_i32_0 = arith.constant 0 : i32
    %c0_i32_1 = arith.constant 0 : i32
    return %c0_i32, %c0_i32_0 : i32, i32
  }
  func.func @transform_2(%arg0: i32) -> (i32, i32) {
    %c0_i32 = arith.constant 0 : i32
    %c0_i32_0 = arith.constant 0 : i32
    %c0_i32_1 = arith.constant 0 : i32
    return %c0_i32, %c0_i32_0 : i32, i32
  }
  func.func @transform_3(%arg0: i32) -> (i32, i32) {
    %c0_i32 = arith.constant 0 : i32
    %c0_i32_0 = arith.constant 0 : i32
    %c0_i32_1 = arith.constant 0 : i32
    return %c0_i32, %c0_i32_0 : i32, i32
  }
  func.func @transform_4(%arg0: i32) -> (i32, i32) {
    %c0_i32 = arith.constant 0 : i32
    %c0_i32_0 = arith.constant 0 : i32
    %c0_i32_1 = arith.constant 0 : i32
    return %c0_i32, %c0_i32_0 : i32, i32
  }
  func.func @transform_5(%arg0: i32) -> (i32, i32) {
    %c0_i32 = arith.constant 0 : i32
    %c0_i32_0 = arith.constant 0 : i32
    %c0_i32_1 = arith.constant 0 : i32
    return %c0_i32, %c0_i32_0 : i32, i32
  }
  func.func @transform_6(%arg0: i32) -> (i32, i32, i32) {
    %c0_i32 = arith.constant 0 : i32
    %c0_i32_0 = arith.constant 0 : i32
    %c0_i32_1 = arith.constant 0 : i32
    return %arg0, %c0_i32, %c0_i32_0 : i32, i32, i32
  }
}

</mosaic_0001>

<bundles_post_ra>
// kernel: tpu_custom_call.1
= control target key start
LH: loop header
LB: loop body
LE: loop exit
PB: predicated region body
PF: predicated region fallthrough
CT: control target
= control target key end

     0   :  { %11 = vsyncpa [#allocation5], 0  ;;  %s1853_s0 = inlined_call_operand.hbm [shape: f32[1,8,32], index: 0, kind: input, shape index: {}]   ;;  %s1854_s1 = inlined_call_operand.hbm [shape: f32[8,32], index: 1, kind: input, shape index: {}]   ;;  %s1855_s2 = inlined_call_operand.hbm [shape: f32[8,32], index: 2, kind: input, shape index: {}]   ;;  %s1856_s3 = inlined_call_operand.vmem [shape: f32[8,32], index: 3, kind: input, shape index: {}]   ;;  %s1857_s4 = inlined_call_operand.hbm [shape: f32[32,1536], index: 4, kind: input, shape index: {}]   ;;  %s1858_s5 = inlined_call_operand.vmem [shape: f32[8,128], index: 5, kind: input, shape index: {}]   ;;  %s1859_s6 = inlined_call_operand.hbm [shape: f32[1,8,128], index: 6, kind: output, shape index: {}]  }
   0x1   :  { %12 = vsyncpa [#allocation8], 0 }
   0x2   :  { %13 = vsyncpa [#allocation11], 0 }
   0x3   :  { %14 = vsyncpa [#allocation6], 0  ;;  %s1633_s21 = smov [#allocation7]   ;;  %s1634_s23 = smov [#allocation4]  }
   0x4   :  { %s31_s22 = sshll.u32 %s1633_s21, 4  ;;  %s21_s24 = sshll.u32 %s1634_s23, 4  ;;  %s32_s22 = int_to_ptr.vmem [resolvable:$true] %s31_s22  ;;  %s22_s24 = int_to_ptr.vmem [resolvable:$true] %s21_s24 }
   0x5   :  { %s1515_s27 = scalar_lea.hbm %s1854_s1, 128 }
   0x6   :  { %p1516_p0 = scmp.ne.s32.totalorder %s1854_s1, %s1515_s27  ;;  %p1519_p1 = scmp.lt.u32.totalorder %s1515_s27, %s1854_s1 }
   0x8   :  { %p1521_p2 = pnand %p1519_p1, %p1516_p0 }
   0xa   :  { %1524 = shalt.err (!%p1521_p2)
}
   0xb   :  { %s1525_s8 = scalar_lea.vmem %s32_s22, 128  ;;  %p1530_p4 = scmp.lt.s32.totalorder %s32_s22, %s32_s22 }
   0xc   :  { %p1526_p3 = scmp.ne.s32.totalorder %s32_s22, %s1525_s8  ;;  %p1531_p5 = scmp.lt.s32.totalorder %s1525_s8, %s1525_s8 }
   0xe   :  { %p1532_p6 = por %p1531_p5, %p1530_p4 }
  0x10   :  { %p1533_p7 = pnand %p1532_p6, %p1526_p3 }
  0x12   :  { %1536 = shalt.err (!%p1533_p7)
}
  0x13   :  { %34 = dma.hbm_to_vmem [thread:$0]  %s1854_s1, 128, %s32_s22, [#allocation8]  }
  0x14   :  { %s1537_s13 = scalar_lea.hbm %s1853_s0, 128 }
  0x15   :  { %p1538_p8 = scmp.ne.s32.totalorder %s1853_s0, %s1537_s13  ;;  %p1541_p9 = scmp.lt.u32.totalorder %s1537_s13, %s1853_s0 }
  0x17   :  { %p1543_p10 = pnand %p1541_p9, %p1538_p8 }
  0x19   :  { %1546 = shalt.err (!%p1543_p10)
}
  0x1a   :  { %s1547_s18 = scalar_lea.vmem %s22_s24, 128  ;;  %p1552_p12 = scmp.lt.s32.totalorder %s22_s24, %s22_s24 }
  0x1b   :  { %p1548_p11 = scmp.ne.s32.totalorder %s22_s24, %s1547_s18  ;;  %p1553_p13 = scmp.lt.s32.totalorder %s1547_s18, %s1547_s18 }
  0x1d   :  { %p1554_p0 = por %p1553_p13, %p1552_p12 }
  0x1f   :  { %p1555_p1 = pnand %p1554_p0, %p1548_p11 }
  0x21   :  { %1558 = shalt.err (!%p1555_p1)
}
  0x22   :  { %24 = dma.hbm_to_vmem [thread:$0]  %s1853_s0, 128, %s22_s24, [#allocation5]  }
  0x23   :  { %s1635_s20 = smov [#allocation9]   ;;  %s1636_s22 = smov [#allocation10]  }
  0x24   :  { %s41_s21 = sshll.u32 %s1635_s20, 4  ;;  %s52_s23 = sshll.u32 %s1636_s22, 4  ;;  %s42_s21 = int_to_ptr.vmem [resolvable:$true] %s41_s21  ;;  %s1705_s23 = int_to_ptr.vmem [resolvable:$true] %s52_s23 }
  0x25   :  { %s1559_s27 = scalar_lea.hbm %s1855_s2, 128 }
  0x26   :  { %p1560_p2 = scmp.ne.s32.totalorder %s1855_s2, %s1559_s27  ;;  %p1563_p3 = scmp.lt.u32.totalorder %s1559_s27, %s1855_s2 }
  0x28   :  { %p1565_p4 = pnand %p1563_p3, %p1560_p2 }
  0x2a   :  { %1568 = shalt.err (!%p1565_p4)
}
  0x2b   :  { %s1569_s0 = scalar_lea.vmem %s42_s21, 128  ;;  %p1574_p6 = scmp.lt.s32.totalorder %s42_s21, %s42_s21 }
  0x2c   :  { %p1570_p5 = scmp.ne.s32.totalorder %s42_s21, %s1569_s0  ;;  %p1575_p7 = scmp.lt.s32.totalorder %s1569_s0, %s1569_s0 }
  0x2e   :  { %p1576_p8 = por %p1575_p7, %p1574_p6 }
  0x30   :  { %p1577_p9 = pnand %p1576_p8, %p1570_p5 }
  0x32   :  { %1580 = shalt.err (!%p1577_p9)
}
  0x33   :  { %44 = dma.hbm_to_vmem [thread:$0]  %s1855_s2, 128, %s42_s21, [#allocation8]  }
  0x34   :  { %s1581_s11 = scalar_lea.hbm %s1857_s4, 6144 }
  0x35   :  { %p1582_p10 = scmp.ne.s32.totalorder %s1857_s4, %s1581_s11  ;;  %p1585_p11 = scmp.lt.u32.totalorder %s1581_s11, %s1857_s4 }
  0x37   :  { %p1587_p12 = pnand %p1585_p11, %p1582_p10 }
  0x39   :  { %1590 = shalt.err (!%p1587_p12)
}
  0x3a   :  { %s1591_s16 = scalar_lea.vmem %s1705_s23, 6144  ;;  %p1596_p0 = scmp.lt.s32.totalorder %s1705_s23, %s1705_s23 }
  0x3b   :  { %p1592_p13 = scmp.ne.s32.totalorder %s1705_s23, %s1591_s16  ;;  %p1597_p1 = scmp.lt.s32.totalorder %s1591_s16, %s1591_s16 }
  0x3d   :  { %p1598_p2 = por %p1597_p1, %p1596_p0 }
  0x3f   :  { %p1599_p3 = pnand %p1598_p2, %p1592_p13 }
  0x41   :  { %1602 = shalt.err (!%p1599_p3)
}
  0x42   :  { %s1637_s2 = smov 1536   ;;  %s1638_s17 = smov 96  }
  0x43   :  { %58 = dma.hbm_to_vmem [thread:$0]  %s1857_s4, 6144, %s1705_s23, [#allocation11], %s1637_s2, %s1637_s2, %s1638_s17  }
  0x44   :  { %1625 = dma.done.wait [#allocation5], 128  }
  0x45   :  { %1626 = vsyncadd [#allocation5], 4294967168 }
  0x46   :  { %1627 = dma.done.wait [#allocation8], 256  }
  0x47   :  { %1628 = vsyncadd [#allocation8], 4294967040 }
  0x48   :  { %1629 = dma.done.wait [#allocation11], 6144  }
  0x49   :  { %1630 = vsyncadd [#allocation11], 4294961152  ;;  %v1639_v0 = vmov 0.0|0.0   ;;  %vm1640_vm0 = vmmov 0   ;;  %v1641_v1 = vmov 0.0   ;;  %v89_v2 = vld [vmem:[#allocation10 + $0x8] sm:$0xff] }
  0x4a   :  { %1410 = vmatprep.subr.bf16.mxu0 %v1639_v0  ;;  %1416 = vmatprep.subr.bf16.mxu1 %v1639_v0  ;;  %v90_v3 = vld [vmem:[#allocation10 + $0x68] sm:$0xff]  ;;  %v85_v4 = vld [vmem:[#allocation10] sm:$0xff]  ;;  %vm78_vm1 = vcmask 261120   ;;  %v77_v12 = vld [vmem:[#allocation7] sm:$0xff]  ;;  %vm246_vm2 = vcmask 64512   ;;  %s1643_s9 = smov 9  }
  0x4b   :  { %1281 = vmatprep.mubr.msk.f32.mxu0 %vm1640_vm0, %v1641_v1  ;;  %1292 = vmatprep.mubr.msk.f32.mxu1 %vm1640_vm0, %v1641_v1  ;;  %v1411_v5 = vpack.c.bf16 %v90_v3, %v89_v2  ;;  %v86_v6 = vld [vmem:[#allocation10 + $0x60] sm:$0xff]  ;;  %v91_v7 = vld [vmem:[#allocation10 + $0xc8] sm:$0xff]  ;;  %79 = vst.msk [vmem:[#allocation2] sm:$0xff] %vm78_vm1, %v77_v12  ;;  %v1189_v19 = vld [vmem:[%s1858_s5] ss:$0 sm:$0xff]  ;;  %s1644_s10 = smov 41  }
  0x4c   :  { %v92_v8 = vld [vmem:[#allocation10 + $0x128] sm:$0xff]  ;;  %v1417_v9 = vpack.c.bf16 %v86_v6, %v85_v4  ;;  %v87_v10 = vld [vmem:[#allocation10 + $0xc0] sm:$0xff]  ;;  %v258_v30 = vld [vmem:[%s1856_s3] sm:$0xff]  ;;  %s1642_s3 = smov 1   ;;  %vm1161_vm3 = vcmask 7168   ;;  %vm1163_vm4 = vcmask 72704  }
  0x4d   :  { %v88_v11 = vld [vmem:[#allocation10 + $0x120] sm:$0xff]  ;;  %1412 = vmatpush3.bf16.msra.mxu0 %v1411_v5  ;;  %v1414_v13 = vpack.c.bf16 %v92_v8, %v91_v7  ;;  %v82_v15 = vld [vmem:[#allocation4] sm:$0xff]  ;;  %v336_v32 = vld [vmem:[#allocation10 + $0x18] sm:$0xff]  ;;  %vm1165_vm5 = vcmask 334848   ;;  %s1645_s13 = smov [#allocation12]   ;;  %vm1167_vm6 = vcmask 596992  }
  0x4e   :  { %1418 = vmatpush3.bf16.msra.mxu1 %v1417_v9  ;;  %1413 = vmatprep.subr.bf16.mxu0 %v1639_v0  ;;  %v1420_v14 = vpack.c.bf16 %v88_v11, %v87_v10  ;;  %v337_v33 = vld [vmem:[#allocation10 + $0x78] sm:$0xff]  ;;  %v332_v38 = vld [vmem:[#allocation10 + $0x10] sm:$0xff]  ;;  %v490_v46 = vld [vmem:[#allocation10 + $0x20] sm:$0xff]  ;;  %s1176_s14 = sshll.u32 %s1645_s13, 4  ;;  %s1177_s14 = int_to_ptr.vmem [resolvable:$true] %s1176_s14 }
  0x4f   :  { %1419 = vmatprep.subr.bf16.mxu1 %v1639_v0  ;;  %v1423_v34 = vpack.c.bf16 %v337_v33, %v336_v32  ;;  %v338_v35 = vld [vmem:[#allocation10 + $0xd8] sm:$0xff]  ;;  %v333_v39 = vld [vmem:[#allocation10 + $0x70] sm:$0xff]  ;;  %v491_v47 = vld [vmem:[#allocation10 + $0x80] sm:$0xff]  ;;  %s1603_s15 = scalar_lea.vmem %s1177_s14, 128  ;;  %p1608_p5 = scmp.lt.s32.totalorder %s1177_s14, %s1177_s14 }
  0x50   :  { %v339_v36 = vld [vmem:[#allocation10 + $0x138] sm:$0xff]  ;;  %v1429_v41 = vpack.c.bf16 %v333_v39, %v332_v38  ;;  %v334_v43 = vld [vmem:[#allocation10 + $0xd0] sm:$0xff]  ;;  %v1441_v48 = vpack.c.bf16 %v491_v47, %v490_v46  ;;  %v494_v49 = vld [vmem:[#allocation10 + $0x40] sm:$0xff]  ;;  %p1604_p4 = scmp.ne.s32.totalorder %s1177_s14, %s1603_s15  ;;  %p1609_p6 = scmp.lt.s32.totalorder %s1603_s15, %s1603_s15 }
  0x51   :  { %1415 = vmatpush3.bf16.msra.mxu0 %v1414_v13  ;;  %v1426_v37 = vpack.c.bf16 %v339_v36, %v338_v35  ;;  %v335_v44 = vld [vmem:[#allocation10 + $0x130] sm:$0xff]  ;;  %v495_v50 = vld [vmem:[#allocation10 + $0xa0] sm:$0xff]  ;;  %v657_v62 = vld [vmem:[#allocation10 + $0x48] sm:$0xff] }
  0x52   :  { %1421 = vmatpush3.bf16.msra.mxu1 %v1420_v14  ;;  %1295 = vmatprep.subr.mxu0 %v1641_v1  ;;  %v1747_v16 = vld [vmem:[#allocation2] sm:$0xff]  ;;  %v1432_v45 = vpack.c.bf16 %v335_v44, %v334_v43  ;;  %v1435_v51 = vpack.c.bf16 %v495_v50, %v494_v49  ;;  %v496_v56 = vld [vmem:[#allocation10 + $0x100] sm:$0xff]  ;;  %v658_v63 = vld [vmem:[#allocation10 + $0xa8] sm:$0xff]  ;;  %p1610_p7 = por %p1609_p6, %p1608_p5 }
  0x53   :  { %1422 = vmatprep.subr.bf16.mxu1 %v1639_v0  ;;  %v497_v57 = vld [vmem:[#allocation10 + $0x160] sm:$0xff]  ;;  %v1447_v2 = vpack.c.bf16 %v658_v63, %v657_v62  ;;  %v659_v3 = vld [vmem:[#allocation10 + $0x108] sm:$0xff]  ;;  %v817_v6 = vld [vmem:[#allocation10 + $0x50] sm:$0xff] }
  0x54   :  { %1282 = vmatmul.mubr.msk.f32.vlgmr.msra.gmra.mrb[0].mxu0 %vm78_vm1, %v1747_v16  ;;  %v1438_v58 = vpack.c.bf16 %v497_v57, %v496_v56  ;;  %v492_v59 = vld [vmem:[#allocation10 + $0xe0] sm:$0xff]  ;;  %v660_v4 = vld [vmem:[#allocation10 + $0x168] sm:$0xff]  ;;  %v818_v7 = vld [vmem:[#allocation10 + $0xb0] sm:$0xff]  ;;  %p1611_p8 = pnand %p1610_p7, %p1604_p4 }
  0x55   :  { %1293 = vmatmul.mubr.msk.f32.vlgmr.msra.gmra.mrb[0].mxu1 %vm78_vm1, %v82_v15  ;;  %1297 = vmatprep.mubr.msk.f32.mxu0 %vm1640_vm0, %v1641_v1  ;;  %v493_v60 = vld [vmem:[#allocation10 + $0x140] sm:$0xff]  ;;  %v1450_v5 = vpack.c.bf16 %v660_v4, %v659_v3  ;;  %v1459_v8 = vpack.c.bf16 %v818_v7, %v817_v6  ;;  %v819_v9 = vld [vmem:[#allocation10 + $0x110] sm:$0xff]  ;;  %v972_v12 = vld [vmem:[#allocation10 + $0x58] sm:$0xff] }
  0x56   :  { %1308 = vmatprep.mubr.msk.f32.mxu1 %vm1640_vm0, %v1641_v1  ;;  %1296 = vmatpush3.msra.mxu0 %v258_v30  ;;  %v1444_v61 = vpack.c.bf16 %v493_v60, %v492_v59  ;;  %v820_v10 = vld [vmem:[#allocation10 + $0x170] sm:$0xff]  ;;  %v973_v13 = vld [vmem:[#allocation10 + $0xb8] sm:$0xff] }
  0x57   :  { %1428 = vmatprep.subr.bf16.mxu0 %v1639_v0  ;;  %1424 = vmatpush3.bf16.msra.mxu1 %v1423_v34  ;;  %v1462_v11 = vpack.c.bf16 %v820_v10, %v819_v9  ;;  %v1471_v14 = vpack.c.bf16 %v973_v13, %v972_v12  ;;  %v815_v33 = vld [vmem:[#allocation10 + $0xf0] sm:$0xff]  ;;  %v968_v36 = vld [vmem:[#allocation10 + $0x38] sm:$0xff] }
  0x58   :  { %1425 = vmatprep.subr.bf16.mxu1 %v1639_v0  ;;  %v816_v34 = vld [vmem:[#allocation10 + $0x150] sm:$0xff]  ;;  %v970_v39 = vld [vmem:[#allocation10 + $0xf8] sm:$0xff] }
  0x59   :  { %v1468_v35 = vpack.c.bf16 %v816_v34, %v815_v33  ;;  %v1200_v56 = vld [vmem:[%s1858_s5 + $0x3] ss:$0 sm:$0xff]  ;;  %v1204_v62 = vld [vmem:[%s1858_s5 + $0x4] ss:$0 sm:$0xff]  ;;  %v1207_v7 = vld [vmem:[%s1858_s5 + $0x5] ss:$0 sm:$0xff] }
  0x5b   :  { %1427 = vmatpush3.bf16.msra.mxu1 %v1426_v37  ;;  %v969_v37 = vld [vmem:[#allocation10 + $0x98] sm:$0xff] }
  0x5c   :  { %1434 = vmatprep.subr.bf16.mxu1 %v1639_v0  ;;  %v1477_v38 = vpack.c.bf16 %v969_v37, %v968_v36 }
 0x127   :  { %v163_v17 = vpop.f32.mrb[0].mxu0 }
 0x128   :  { %v236_v18 = vpop.f32.mrb[0].mxu1  ;;  %v1283_v21 = vpop.f32.mrb[1].mxu0 }
 0x129   :  { %v237_v20 = vadd.f32 %v236_v18, %v163_v17  ;;  %v1294_v22 = vpop.f32.mrb[1].mxu1  ;;  %v975_v17 = vld [vmem:[#allocation10 + $0x178] sm:$0xff] }
 0x12b   :  { %v245_v23 = vadd.f32 %v1189_v19, %v237_v20  ;;  %v1193_v20 = vld [vmem:[%s1858_s5 + $0x1] ss:$0 sm:$0xff] }
 0x12d   :  { %v247_v24 = vsel %vm246_vm2, %v245_v23, -inf }
 0x12e   :  { %248 = vmax.xlane.f32.xlu0 %v247_v24  ;;  %v654_v24 = vld [vmem:[#allocation10 + $0x88] sm:$0xff] }
 0x1bb   :  { %v249_v25 = vpop.xlane.xlu0 %248 }
 0x1bc   :  { %v250_v26 = vsub.f32 %v245_v23, %v249_v25  ;;  %v653_v23 = vld [vmem:[#allocation10 + $0x28] sm:$0xff] }
 0x1be   :  { %v251_v27 = vmul.f32 1.442695, %v250_v26  ;;  %v1453_v26 = vpack.c.bf16 %v654_v24, %v653_v23 }
 0x1c0   :  { %1495 = vpow2.f32 %v251_v27 }
 0x1ca   :  { %v1496_v28 = vpop.eup %1495 }
 0x1cb   :  { %v253_v29 = vsel %vm246_vm2, %v1496_v28, 0.0 }
 0x1cc   :  { %254 = vadd.xlane.f32.xlu0 %v253_v29  ;;  %v656_v29 = vld [vmem:[#allocation10 + $0x148] sm:$0xff] }
 0x259   :  { %v255_v31 = vpop.xlane.xlu0 %254 }
 0x25a   :  { %1497 = vrcp.f32 %v255_v31  ;;  %v814_v31 = vld [vmem:[#allocation10 + $0x90] sm:$0xff] }
 0x264   :  { %v1498_v40 = vpop.eup %1497 }
 0x265   :  { %v257_v42 = vmul.f32 %v1498_v40, %v1496_v28  ;;  %v655_v28 = vld [vmem:[#allocation10 + $0xe8] sm:$0xff]  ;;  %v971_v40 = vld [vmem:[#allocation10 + $0x158] sm:$0xff] }
 0x266   :  { %v1456_v30 = vpack.c.bf16 %v656_v29, %v655_v28 }
 0x267   :  { %1150 = vrot.lane.b32.xlu1 %v257_v42, %s1642_s3  ;;  %1298 = vmatmul.mubr.msk.f32.vlgmr.msra.gmra.mrb[2].mxu0 %vm246_vm2, %v257_v42 }
 0x268   :  { %1430 = vmatpush3.bf16.msra.mxu0 %v1429_v41  ;;  %1319 = vmatprep.mubr.msk.f32.mxu0 %vm1640_vm0, %v1641_v1  ;;  %v1480_v41 = vpack.c.bf16 %v971_v40, %v970_v39 }
 0x269   :  { %1431 = vmatprep.subr.bf16.mxu0 %v1639_v0 }
 0x26c   :  { %1433 = vmatpush3.bf16.msra.mxu0 %v1432_v45 }
 0x26d   :  { %1440 = vmatprep.subr.bf16.mxu0 %v1639_v0 }
 0x26f   :  { %1320 = vmatmul.mubr.msk.f32.vlgmr.msra.gmra.mrb[4].mxu0 %vm78_vm1, %v82_v15  ;;  %v974_v15 = vld [vmem:[#allocation10 + $0x118] sm:$0xff] }
 0x270   :  { %1341 = vmatprep.mubr.msk.f32.mxu0 %vm1640_vm0, %v1641_v1  ;;  %1442 = vmatpush3.bf16.msra.mxu0 %v1441_v48  ;;  %v1474_v18 = vpack.c.bf16 %v975_v17, %v974_v15  ;;  %v80_v48 = vld [vmem:[#allocation9] sm:$0xff] }
 0x271   :  { %1443 = vmatprep.subr.bf16.mxu0 %v1639_v0  ;;  %81 = vst.msk [vmem:[#allocation3] sm:$0xff] %vm78_vm1, %v80_v48 }
 0x274   :  { %1445 = vmatpush3.bf16.msra.mxu0 %v1444_v61 }
 0x275   :  { %1452 = vmatprep.subr.bf16.mxu0 %v1639_v0 }
 0x33a   :  { %v328_v52 = vpop.f32.mrb[2].mxu0 }
 0x33b   :  { %v1299_v53 = vpop.f32.mrb[3].mxu0  ;;  %1309 = vmatmul.mubr.msk.f32.vlgmr.msra.gmra.mrb[2].mxu1 %vm78_vm1, %v328_v52 }
 0x33c   :  { %1436 = vmatpush3.bf16.msra.mxu1 %v1435_v51  ;;  %1330 = vmatprep.mubr.msk.f32.mxu1 %vm1640_vm0, %v1641_v1 }
 0x33d   :  { %1437 = vmatprep.subr.bf16.mxu1 %v1639_v0 }
 0x340   :  { %1439 = vmatpush3.bf16.msra.mxu1 %v1438_v58 }
 0x341   :  { %1446 = vmatprep.subr.bf16.mxu1 %v1639_v0 }
 0x342   :  { %v479_v54 = vpop.f32.mrb[4].mxu0 }
 0x343   :  { %v1321_v55 = vpop.f32.mrb[5].mxu0  ;;  %1331 = vmatmul.mubr.msk.f32.vlgmr.msra.gmra.mrb[4].mxu1 %vm78_vm1, %v1747_v16 }
 0x344   :  { %1448 = vmatpush3.bf16.msra.mxu1 %v1447_v2  ;;  %1352 = vmatprep.mubr.msk.f32.mxu1 %vm1640_vm0, %v1641_v1 }
 0x345   :  { %1449 = vmatprep.subr.bf16.mxu1 %v1639_v0 }
 0x348   :  { %1451 = vmatpush3.bf16.msra.mxu1 %v1450_v5 }
 0x349   :  { %1458 = vmatprep.subr.bf16.mxu1 %v1639_v0 }
 0x34b   :  { %1353 = vmatmul.mubr.msk.f32.vlgmr.msra.gmra.mrb[6].mxu1 %vm78_vm1, %v1747_v16 }
 0x34c   :  { %1460 = vmatpush3.bf16.msra.mxu1 %v1459_v8  ;;  %1374 = vmatprep.mubr.msk.f32.mxu1 %vm1640_vm0, %v1641_v1 }
 0x34d   :  { %1461 = vmatprep.subr.bf16.mxu1 %v1639_v0 }
 0x350   :  { %1463 = vmatpush3.bf16.msra.mxu1 %v1462_v11 }
 0x351   :  { %1470 = vmatprep.subr.bf16.mxu1 %v1639_v0 }
 0x353   :  { %1375 = vmatmul.mubr.msk.f32.vlgmr.msra.gmra.mrb[8].mxu1 %vm78_vm1, %v1747_v16 }
 0x354   :  { %1472 = vmatpush3.bf16.msra.mxu1 %v1471_v14  ;;  %1396 = vmatprep.mubr.msk.f32.mxu1 %vm1640_vm0, %v1641_v1 }
 0x355   :  { %1473 = vmatprep.subr.bf16.mxu1 %v1639_v0 }
 0x358   :  { %1475 = vmatpush3.bf16.msra.mxu1 %v1474_v18  ;;  %v84_v18 = vld [vmem:[#allocation3] sm:$0xff] }
 0x35b   :  { %1397 = vmatmul.mubr.msk.f32.vlgmr.msra.gmra.mrb[10].mxu1 %vm78_vm1, %v1747_v16  ;;  %v813_v16 = vld [vmem:[#allocation10 + $0x30] sm:$0xff] }
 0x35c   :  { %v1465_v32 = vpack.c.bf16 %v814_v31, %v813_v16  ;;  %v1210_v16 = vld [vmem:[%s1858_s5 + $0x7] ss:$0 sm:$0xff] }
 0x40e   :  { %v409_v19 = vpop.f32.mrb[2].mxu1 }
 0x40f   :  { %v480_v21 = vadd.f32 %v479_v54, %v409_v19  ;;  %v1310_v22 = vpop.f32.mrb[3].mxu1 }
 0x411   :  { %v488_v25 = vadd.f32 %v1193_v20, %v480_v21 }
 0x413   :  { %v489_v27 = vmax.f32 %v488_v25, 0.0 }
 0x415   :  { %1342 = vmatmul.mubr.msk.f32.vlgmr.msra.gmra.mrb[6].mxu0 %vm78_vm1, %v489_v27 }
 0x416   :  { %1454 = vmatpush3.bf16.msra.mxu0 %v1453_v26  ;;  %1363 = vmatprep.mubr.msk.f32.mxu0 %vm1640_vm0, %v1641_v1  ;;  %v564_v42 = vpop.f32.mrb[4].mxu1  ;;  %v1209_v26 = vld [vmem:[%s1858_s5 + $0x6] ss:$0 sm:$0xff] }
 0x417   :  { %1455 = vmatprep.subr.bf16.mxu0 %v1639_v0  ;;  %v1332_v43 = vpop.f32.mrb[5].mxu1 }
 0x41a   :  { %1457 = vmatpush3.bf16.msra.mxu0 %v1456_v30  ;;  %v1151_v30 = vpop.permute.xlu1 %1150 }
 0x41b   :  { %1464 = vmatprep.subr.bf16.mxu0 %v1639_v0 }
 0x41d   :  { %1364 = vmatmul.mubr.msk.f32.vlgmr.msra.gmra.mrb[8].mxu0 %vm78_vm1, %v489_v27 }
 0x41e   :  { %1466 = vmatpush3.bf16.msra.mxu0 %v1465_v32  ;;  %1385 = vmatprep.mubr.msk.f32.mxu0 %vm1640_vm0, %v1641_v1  ;;  %v727_v44 = vpop.f32.mrb[6].mxu1 }
 0x41f   :  { %1467 = vmatprep.subr.bf16.mxu0 %v1639_v0  ;;  %v1354_v45 = vpop.f32.mrb[7].mxu1 }
 0x422   :  { %1469 = vmatpush3.bf16.msra.mxu0 %v1468_v35 }
 0x423   :  { %1476 = vmatprep.subr.bf16.mxu0 %v1639_v0 }
 0x425   :  { %1386 = vmatmul.mubr.msk.f32.vlgmr.msra.gmra.mrb[10].mxu0 %vm78_vm1, %v489_v27 }
 0x426   :  { %1478 = vmatpush3.bf16.msra.mxu0 %v1477_v38  ;;  %1407 = vmatprep.mubr.msk.f32.mxu0 %vm1640_vm0, %v1641_v1  ;;  %v887_v46 = vpop.f32.mrb[8].mxu1  ;;  %v1196_v1 = vld [vmem:[%s1858_s5 + $0x2] ss:$0 sm:$0xff] }
 0x427   :  { %1479 = vmatprep.subr.bf16.mxu0 %v1639_v0  ;;  %v1376_v47 = vpop.f32.mrb[9].mxu1 }
 0x42a   :  { %1481 = vmatpush3.bf16.msra.mxu0 %v1480_v41 }
 0x42d   :  { %1408 = vmatmul.mubr.msk.f32.vlgmr.msra.gmra.mrb[12].mxu0 %vm78_vm1, %v489_v27 }
 0x42e   :  { %v1042_v49 = vpop.f32.mrb[10].mxu1 }
 0x42f   :  { %v1398_v50 = vpop.f32.mrb[11].mxu1 }
 0x4e8   :  { %v637_v51 = vpop.f32.mrb[6].mxu0 }
 0x4e9   :  { %v638_v0 = vadd.f32 %v637_v51, %v564_v42  ;;  %v1343_v52 = vpop.f32.mrb[7].mxu0 }
 0x4eb   :  { %v646_v53 = vadd.f32 %v1196_v1, %v638_v0 }
 0x4ed   :  { %v1197_v54 = vmul.f32 -1.442695, %v646_v53 }
 0x4ef   :  { %1499 = vpow2.f32 %v1197_v54 }
 0x4f0   :  { %v797_v55 = vpop.f32.mrb[8].mxu0 }
 0x4f1   :  { %v798_v57 = vadd.f32 %v797_v55, %v727_v44  ;;  %v1365_v58 = vpop.f32.mrb[9].mxu0 }
 0x4f3   :  { %v806_v59 = vadd.f32 %v1200_v56, %v798_v57 }
 0x4f5   :  { %v1201_v60 = vmul.f32 -1.442695, %v806_v59 }
 0x4f7   :  { %1501 = vpow2.f32 %v1201_v60 }
 0x4f8   :  { %v957_v61 = vpop.f32.mrb[10].mxu0 }
 0x4f9   :  { %v1500_v63 = vpop.eup %1499  ;;  %v958_v2 = vadd.f32 %v957_v61, %v887_v46  ;;  %v1387_v3 = vpop.f32.mrb[11].mxu0 }
 0x4fa   :  { %v650_v4 = vadd.f32 1.0, %v1500_v63 }
 0x4fb   :  { %v966_v5 = vadd.f32 %v1204_v62, %v958_v2 }
 0x4fc   :  { %1503 = vrcp.f32 %v650_v4 }
 0x4fd   :  { %1505 = vtanh.f32 %v966_v5 }
 0x500   :  { %v1112_v6 = vpop.f32.mrb[12].mxu0 }
 0x501   :  { %v1502_v8 = vpop.eup %1501  ;;  %v1113_v9 = vadd.f32 %v1112_v6, %v1042_v49  ;;  %v1409_v10 = vpop.f32.mrb[13].mxu0 }
 0x502   :  { %v810_v11 = vadd.f32 1.0, %v1502_v8 }
 0x503   :  { %v1121_v12 = vadd.f32 %v1207_v7, %v1113_v9 }
 0x504   :  { %1507 = vrcp.f32 %v810_v11 }
 0x505   :  { %v1208_v13 = vmul.f32 -1.442695, %v1121_v12 }
 0x506   :  { %v1504_v14 = vpop.eup %1503 }
 0x507   :  { %v1506_v15 = vpop.eup %1505  ;;  %1509 = vpow2.f32 %v1208_v13 }
 0x508   :  { %v1129_v17 = vmul.f32 %v1506_v15, %v1504_v14 }
 0x50e   :  { %v1508_v19 = vpop.eup %1507 }
 0x50f   :  { %v1128_v20 = vmul.f32 %v1508_v19, %v84_v18 }
 0x511   :  { %v1510_v21 = vpop.eup %1509  ;;  %v1130_v22 = vadd.f32 %v1129_v17, %v1128_v20 }
 0x512   :  { %v1125_v23 = vadd.f32 1.0, %v1510_v21 }
 0x513   :  { %1134 = vst.msk [vmem:[#allocation3] sm:$0xff] %vm78_vm1, %v1130_v22  ;;  %1511 = vtanh.f32 %v1130_v22 }
 0x514   :  { %1513 = vrcp.f32 %v1125_v23 }
 0x51d   :  { %v1512_v24 = vpop.eup %1511 }
 0x51e   :  { %v1514_v25 = vpop.eup %1513 }
 0x51f   :  { %v1132_v27 = vmul.f32 %v1514_v25, %v1512_v24 }
 0x521   :  { %1154 = vrot.lane.b32.xlu0 %v1132_v27, %s1643_s9  ;;  %1133 = vst.msk [vmem:[#allocation2] sm:$0xff] %vm78_vm1, %v1132_v27  ;;  %v1140_v28 = vmul.f32 %v1209_v26, %v1132_v27 }
 0x523   :  { %v1141_v29 = vsel %vm78_vm1, %v1140_v28, 0.0 }
 0x524   :  { %1142 = vadd.xlane.f32.xlu1 %v1141_v29 }
 0x535   :  { %1158 = vrot.lane.b32.xlu1 %v1130_v22, %s1644_s10 }
 0x593   :  { %v1155_v33 = vpop.permute.xlu0 %1154 }
 0x5b1   :  { %v1143_v31 = vpop.xlane.xlu1 %1142 }
 0x5b2   :  { %v1149_v32 = vadd.f32 %v1210_v16, %v1143_v31 }
 0x5b4   :  { %v1162_v34 = vsel %vm1161_vm3, %v1149_v32, %v1151_v30 }
 0x5b5   :  { %v1164_v35 = vsel %vm1163_vm4, %v1162_v34, %v1155_v33  ;;  %v1159_v36 = vpop.permute.xlu1 %1158 }
 0x5b6   :  { %v1166_v37 = vsel %vm1165_vm5, %v1164_v35, %v1159_v36 }
 0x5b7   :  { %v1168_v38 = vsel %vm1167_vm6, %v1166_v37, 0.0 }
 0x5b8   :  { %1169 = vst [vmem:[#allocation12] sm:$0xff] %v1168_v38 }
 0x5b9   :  { %1614 = shalt.err (!%p1611_p8)
}
 0x5ba   :  { %s1615_s2 = scalar_lea.hbm %s1859_s6, 128 }
 0x5bb   :  { %p1616_p9 = scmp.ne.s32.totalorder %s1859_s6, %s1615_s2  ;;  %p1619_p10 = scmp.lt.u32.totalorder %s1615_s2, %s1859_s6 }
 0x5bd   :  { %p1621_p11 = pnand %p1619_p10, %p1616_p9 }
 0x5bf   :  { %1624 = shalt.err (!%p1621_p11)
}
 0x5c0   :  { %1179 = dma.vmem_to_hbm [thread:$0]  %s1177_s14, 128, %s1859_s6, [#allocation6]  }
 0x5c1   :  { %1631 = dma.done.wait [#allocation6], 128  }
 0x5c2   :  { %1632 = vsyncadd [#allocation6], 4294967168 }
 0x5c3   :  { %1183 = vsyncpa [#allocation5], 1 }
 0x5c4   :  { %1184 = vsyncpa [#allocation8], 1 }
 0x5c5   :  { %1185 = vsyncpa [#allocation11], 1 }
 0x5c6   :  { %1186 = vsyncpa [#allocation6], 1 }

</bundles_post_ra>
